<compile_context>
chip_gen: v7x
topology: tpu7x:2x2x1
jax: 0.10.0
libtpu: 0.0.40
codegen_flags: <defaults>
</compile_context>

<pallas_src>
import functools

import jax
import jax.numpy as jnp
from jax import lax
from jax.experimental import pallas as pl
from jax.experimental.pallas import tpu as pltpu


def _label_smooth_kernel(x_ref, t_ref, o_ref, m_sc, l_sc, sx_sc, xt_sc, *,
                         smoothing: float, num_classes: int):
    # x_ref : (bm, bc) logits tile (input dtype)
    # t_ref : (bm, 1)  int32 target indices (same block for every class step)
    # o_ref : (bm, 1)  f32 per-row loss, written on the last class step
    # scratch (all (bm, 1) f32): running max, running sum(exp), running
    # sum(logits), running logits[target]
    k = pl.program_id(1)
    nk = pl.num_programs(1)

    @pl.when(k == 0)
    def _():
        m_sc[...] = jnp.full_like(m_sc[...], -jnp.inf)
        l_sc[...] = jnp.zeros_like(l_sc[...])
        sx_sc[...] = jnp.zeros_like(sx_sc[...])
        xt_sc[...] = jnp.zeros_like(xt_sc[...])

    x = x_ref[...].astype(jnp.float32)
    bm, bc = x.shape

    # --- online logsumexp over the class axis ---
    m_prev = m_sc[...]
    m_new = jnp.maximum(m_prev, jnp.max(x, axis=-1, keepdims=True))
    l_sc[...] = (jnp.exp(m_prev - m_new) * l_sc[...]
                 + jnp.sum(jnp.exp(x - m_new), axis=-1, keepdims=True))
    m_sc[...] = m_new

    # --- running sum(logits) and logits[target] ---
    # (iota == target compare instead of scatter_)
    sx_sc[...] = sx_sc[...] + jnp.sum(x, axis=-1, keepdims=True)
    col = lax.broadcasted_iota(jnp.int32, (bm, bc), dimension=1) + k * bc
    tgt = t_ref[...]  # (bm, 1) int32, broadcasts over lanes
    xt_sc[...] = xt_sc[...] + jnp.sum(
        jnp.where(col == tgt, x, 0.0), axis=-1, keepdims=True)

    @pl.when(k == nk - 1)
    def _():
        lse = m_sc[...] + jnp.log(l_sc[...])  # (bm, 1), full logsumexp
        off = smoothing / (num_classes - 1.0) if num_classes > 1 else 0.0
        on = 1.0 - smoothing
        # sum_c weight_c * log_prob_c = off*sum(log_prob) + (on-off)*log_prob[t]
        sum_log_prob = sx_sc[...] - jnp.float32(num_classes) * lse
        log_prob_tgt = xt_sc[...] - lse
        o_ref[...] = -(jnp.float32(off) * sum_log_prob
                       + jnp.float32(on - off) * log_prob_tgt)


def _round_up(x, m):
    return ((x + m - 1) // m) * m


def _choose_block_cols(C):
    # Last block dim must equal C, or be a multiple of 128 that divides C.
    if C % 128 == 0:
        bc = 128
        while bc * 2 <= min(C, 2048) and C % (bc * 2) == 0:
            bc *= 2
        return bc
    return C


def _choose_block_rows(N, block_cols, itemsize,
                       target_tile_bytes=2 * 1024 * 1024, max_rows=1024):
    rows = target_tile_bytes // max(1, block_cols * itemsize)
    rows = int(max(8, min(max_rows, (rows // 8) * 8)))
    n_pad8 = _round_up(max(N, 1), 8)
    return min(rows, n_pad8)


def label_smooth_loss(logits, targets, *, smoothing=0.0, reduction="mean",
                      block_rows=None, block_cols=None):
    """Pallas implementation of LabelSmoothLoss.forward."""
    N, C = logits.shape
    itemsize = jnp.dtype(logits.dtype).itemsize

    if block_cols is None:
        block_cols = _choose_block_cols(C)
    assert C % block_cols == 0 and (block_cols == C or block_cols % 128 == 0)

    if block_rows is None:
        block_rows = _choose_block_rows(N, block_cols, itemsize)
    assert block_rows % 8 == 0

    # Pad ragged batches; padded rows are sliced off before the reduction.
    N_pad = _round_up(N, block_rows)
    if N_pad != N:
        logits = jnp.pad(logits, ((0, N_pad - N), (0, 0)))
        targets = jnp.pad(targets, (0, N_pad - N))
    targets2d = targets.astype(jnp.int32).reshape(N_pad, 1)

    grid = (N_pad // block_rows, C // block_cols)

    kernel = functools.partial(_label_smooth_kernel,
                               smoothing=float(smoothing), num_classes=C)

    cost = pl.CostEstimate(
        flops=int(5 * N * C),
        transcendentals=int(N * C),
        bytes_accessed=int(N * C * itemsize + 2 * N * 4),
    )

    per_row = pl.pallas_call(
        kernel,
        out_shape=jax.ShapeDtypeStruct((N_pad, 1), jnp.float32),
        grid_spec=pltpu.PrefetchScalarGridSpec(
            num_scalar_prefetch=0,
            grid=grid,
            in_specs=[
                pl.BlockSpec((block_rows, block_cols), lambda i, k: (i, k)),
                pl.BlockSpec((block_rows, 1), lambda i, k: (i, 0)),
            ],
            out_specs=pl.BlockSpec((block_rows, 1), lambda i, k: (i, 0)),
            scratch_shapes=[pltpu.VMEM((block_rows, 1), jnp.float32)] * 4,
        ),
        compiler_params=pltpu.CompilerParams(
            dimension_semantics=("parallel", "arbitrary"),
            vmem_limit_bytes=32 * 1024 * 1024,
        ),
        cost_estimate=cost,
    )(logits, targets2d)  # NOTE: no wrapper-side upcast; dtype passes through

    per_row = per_row[:N, 0]  # drop padded rows
    if reduction == "mean":
        return jnp.mean(per_row)
    elif reduction == "none":
        return per_row
    else:
        raise ValueError(f"unsupported reduction: {reduction}")


def _reference(logits, targets, smoothing, reduction):
    # Plain-JAX reference mirroring the PyTorch module.
    N, C = logits.shape
    x = logits.astype(jnp.float32)
    log_prob = jax.nn.log_softmax(x, axis=-1)
    onehot = jax.nn.one_hot(targets, C, dtype=jnp.float32)
    off = smoothing / (C - 1.0)
    weight = off * (1.0 - onehot) + (1.0 - smoothing) * onehot
    loss = jnp.sum(-weight * log_prob, axis=-1)
    return jnp.mean(loss) if reduction == "mean" else loss


if __name__ == "__main__":
    key = jax.random.PRNGKey(0)
    k1, k2, k3, k4 = jax.random.split(key, 4)

    # Case 1: small f32 problem, single class tile, both reductions.
    N, C, s = 8, 32, 0.1
    logits = jax.random.normal(k1, (N, C), dtype=jnp.float32)
    targets = jax.random.randint(k2, (N,), 0, C, dtype=jnp.int32)

    out = jax.block_until_ready(
        label_smooth_loss(logits, targets, smoothing=s, reduction="mean"))
    ref = _reference(logits, targets, s, "mean")
    assert jnp.allclose(out, ref, atol=1e-5, rtol=1e-5), (out, ref)

    out_none = jax.block_until_ready(
        label_smooth_loss(logits, targets, smoothing=s, reduction="none"))
    ref_none = _reference(logits, targets, s, "none")
    assert jnp.allclose(out_none, ref_none, atol=1e-5, rtol=1e-5)

    # Case 2: ragged batch, bf16 logits, class axis split into two tiles
    # (exercises the online-logsumexp path, dtype pass-through, row padding).
    N2, C2, s2 = 20, 256, 0.2
    logits2 = jax.random.normal(k3, (N2, C2), dtype=jnp.bfloat16)
    targets2 = jax.random.randint(k4, (N2,), 0, C2, dtype=jnp.int32)

    out2 = jax.block_until_ready(
        label_smooth_loss(logits2, targets2, smoothing=s2, reduction="mean",
                          block_cols=128))
    ref2 = _reference(logits2, targets2, s2, "mean")
    assert jnp.allclose(out2, ref2, atol=1e-4, rtol=1e-4), (out2, ref2)

    print("KERNEL_OK")
</pallas_src>

<mosaic_0001>
module attributes {stable_mosaic.version = 11 : i64} {
  func.func @_label_smooth_kernel(%arg0: i32, %arg1: i32, %arg2: memref<8x32xf32, #tpu.memory_space<vmem>>, %arg3: memref<8x1xi32, #tpu.memory_space<vmem>>, %arg4: memref<8x1xf32, #tpu.memory_space<vmem>>, %arg5: memref<8x1xf32, #tpu.memory_space<vmem>>, %arg6: memref<8x1xf32, #tpu.memory_space<vmem>>, %arg7: memref<8x1xf32, #tpu.memory_space<vmem>>, %arg8: memref<8x1xf32, #tpu.memory_space<vmem>>) attributes {dimension_semantics = [#tpu.dimension_semantics<parallel>, #tpu.dimension_semantics<arbitrary>], iteration_bounds = array<i64: 1, 1>, scalar_prefetch = 0 : i64, scratch_operands = 4 : i64, tpu.core_type = #tpu.core_type<tc>, window_params = [{transform_indices = @transform_0, window_bounds = array<i64: 8, 32>}, {transform_indices = @transform_1, window_bounds = array<i64: 8, 1>}, {transform_indices = @transform_2, window_bounds = array<i64: 8, 1>}]} {
    %c0_i32 = arith.constant 0 : i32
    %0 = arith.cmpi eq, %arg1, %c0_i32 : i32
    %1 = arith.extui %0 : i1 to i32
    %c0_i32_0 = arith.constant 0 : i32
    %2 = arith.cmpi ne, %1, %c0_i32_0 : i32
    scf.if %2 {
      %cst_26 = arith.constant 0xFF800000 : f32
      %42 = vector.broadcast %cst_26 : f32 to vector<8x1xf32>
      %c0_27 = arith.constant 0 : index
      %c0_28 = arith.constant 0 : index
      %43 = vector.load %arg5[%c0_27, %c0_28] : memref<8x1xf32, #tpu.memory_space<vmem>>, vector<8x1xf32>
      tpu.vector_store %arg5[%c0_27, %c0_28], %42 {strides = array<i32>} : memref<8x1xf32, #tpu.memory_space<vmem>>, vector<8x1xf32>,
      %cst_29 = arith.constant 0.000000e+00 : f32
      %44 = vector.broadcast %cst_29 : f32 to vector<8x1xf32>
      %c0_30 = arith.constant 0 : index
      %c0_31 = arith.constant 0 : index
      %45 = vector.load %arg6[%c0_30, %c0_31] : memref<8x1xf32, #tpu.memory_space<vmem>>, vector<8x1xf32>
      tpu.vector_store %arg6[%c0_30, %c0_31], %44 {strides = array<i32>} : memref<8x1xf32, #tpu.memory_space<vmem>>, vector<8x1xf32>,
      %cst_32 = arith.constant 0.000000e+00 : f32
      %46 = vector.broadcast %cst_32 : f32 to vector<8x1xf32>
      %c0_33 = arith.constant 0 : index
      %c0_34 = arith.constant 0 : index
      %47 = vector.load %arg7[%c0_33, %c0_34] : memref<8x1xf32, #tpu.memory_space<vmem>>, vector<8x1xf32>
      tpu.vector_store %arg7[%c0_33, %c0_34], %46 {strides = array<i32>} : memref<8x1xf32, #tpu.memory_space<vmem>>, vector<8x1xf32>,
      %cst_35 = arith.constant 0.000000e+00 : f32
      %48 = vector.broadcast %cst_35 : f32 to vector<8x1xf32>
      %c0_36 = arith.constant 0 : index
      %c0_37 = arith.constant 0 : index
      %49 = vector.load %arg8[%c0_36, %c0_37] : memref<8x1xf32, #tpu.memory_space<vmem>>, vector<8x1xf32>
      tpu.vector_store %arg8[%c0_36, %c0_37], %48 {strides = array<i32>} : memref<8x1xf32, #tpu.memory_space<vmem>>, vector<8x1xf32>,
    } else {
    }
    %c0 = arith.constant 0 : index
    %c0_1 = arith.constant 0 : index
    %3 = vector.load %arg2[%c0, %c0_1] : memref<8x32xf32, #tpu.memory_space<vmem>>, vector<8x32xf32>
    %c0_2 = arith.constant 0 : index
    %c0_3 = arith.constant 0 : index
    %4 = vector.load %arg5[%c0_2, %c0_3] : memref<8x1xf32, #tpu.memory_space<vmem>>, vector<8x1xf32>
    %cst = arith.constant dense<0xFF800000> : vector<8xf32>
    %5 = vector.multi_reduction <maximumf>, %3, %cst [1] : vector<8x32xf32> to vector<8xf32>
    %6 = vector.shape_cast %5 : vector<8xf32> to vector<8x1xf32>
    %7 = arith.maximumf %4, %6 : vector<8x1xf32>
    %8 = arith.subf %4, %7 : vector<8x1xf32>
    %9 = math.exp %8 : vector<8x1xf32>
    %c0_4 = arith.constant 0 : index
    %c0_5 = arith.constant 0 : index
    %10 = vector.load %arg6[%c0_4, %c0_5] : memref<8x1xf32, #tpu.memory_space<vmem>>, vector<8x1xf32>
    %11 = arith.mulf %9, %10 : vector<8x1xf32>
    %12 = vector.broadcast %7 : vector<8x1xf32> to vector<8x32xf32>
    %13 = arith.subf %3, %12 : vector<8x32xf32>
    %14 = math.exp %13 : vector<8x32xf32>
    %cst_6 = arith.constant dense<0.000000e+00> : vector<8xf32>
    %15 = vector.multi_reduction <add>, %14, %cst_6 [1] : vector<8x32xf32> to vector<8xf32>
    %16 = vector.shape_cast %15 : vector<8xf32> to vector<8x1xf32>
    %17 = arith.addf %11, %16 : vector<8x1xf32>
    %c0_7 = arith.constant 0 : index
    %c0_8 = arith.constant 0 : index
    %18 = vector.load %arg6[%c0_7, %c0_8] : memref<8x1xf32, #tpu.memory_space<vmem>>, vector<8x1xf32>
    tpu.vector_store %arg6[%c0_7, %c0_8], %17 {strides = array<i32>} : memref<8x1xf32, #tpu.memory_space<vmem>>, vector<8x1xf32>,
    %c0_9 = arith.constant 0 : index
    %c0_10 = arith.constant 0 : index
    %19 = vector.load %arg5[%c0_9, %c0_10] : memref<8x1xf32, #tpu.memory_space<vmem>>, vector<8x1xf32>
    tpu.vector_store %arg5[%c0_9, %c0_10], %7 {strides = array<i32>} : memref<8x1xf32, #tpu.memory_space<vmem>>, vector<8x1xf32>,
    %c0_11 = arith.constant 0 : index
    %c0_12 = arith.constant 0 : index
    %20 = vector.load %arg7[%c0_11, %c0_12] : memref<8x1xf32, #tpu.memory_space<vmem>>, vector<8x1xf32>
    %cst_13 = arith.constant dense<0.000000e+00> : vector<8xf32>
    %21 = vector.multi_reduction <add>, %3, %cst_13 [1] : vector<8x32xf32> to vector<8xf32>
    %22 = vector.shape_cast %21 : vector<8xf32> to vector<8x1xf32>
    %23 = arith.addf %20, %22 : vector<8x1xf32>
    %c0_14 = arith.constant 0 : index
    %c0_15 = arith.constant 0 : index
    %24 = vector.load %arg7[%c0_14, %c0_15] : memref<8x1xf32, #tpu.memory_space<vmem>>, vector<8x1xf32>
    tpu.vector_store %arg7[%c0_14, %c0_15], %23 {strides = array<i32>} : memref<8x1xf32, #tpu.memory_space<vmem>>, vector<8x1xf32>,
    %25 = tpu.iota {dimensions = array<i32: 1>} : vector<8x32xi32>
    %c32_i32 = arith.constant 32 : i32
    %26 = arith.muli %arg1, %c32_i32 : i32
    %27 = vector.broadcast %26 : i32 to vector<8x32xi32>
    %28 = arith.addi %25, %27 : vector<8x32xi32>
    %c0_16 = arith.constant 0 : index
    %c0_17 = arith.constant 0 : index
    %29 = vector.load %arg3[%c0_16, %c0_17] : memref<8x1xi32, #tpu.memory_space<vmem>>, vector<8x1xi32>
    %c0_18 = arith.constant 0 : index
    %c0_19 = arith.constant 0 : index
    %30 = vector.load %arg8[%c0_18, %c0_19] : memref<8x1xf32, #tpu.memory_space<vmem>>, vector<8x1xf32>
    %31 = vector.broadcast %29 : vector<8x1xi32> to vector<8x32xi32>
    %32 = arith.cmpi eq, %28, %31 : vector<8x32xi32>
    %cst_20 = arith.constant 0.000000e+00 : f32
    %33 = vector.broadcast %cst_20 : f32 to vector<8x32xf32>
    %34 = arith.select %32, %3, %33 : vector<8x32xi1>, vector<8x32xf32>
    %cst_21 = arith.constant dense<0.000000e+00> : vector<8xf32>
    %35 = vector.multi_reduction <add>, %34, %cst_21 [1] : vector<8x32xf32> to vector<8xf32>
    %36 = vector.shape_cast %35 : vector<8xf32> to vector<8x1xf32>
    %37 = arith.addf %30, %36 : vector<8x1xf32>
    %c0_22 = arith.constant 0 : index
    %c0_23 = arith.constant 0 : index
    %38 = vector.load %arg8[%c0_22, %c0_23] : memref<8x1xf32, #tpu.memory_space<vmem>>, vector<8x1xf32>
    tpu.vector_store %arg8[%c0_22, %c0_23], %37 {strides = array<i32>} : memref<8x1xf32, #tpu.memory_space<vmem>>, vector<8x1xf32>,
    %c0_i32_24 = arith.constant 0 : i32
    %39 = arith.cmpi eq, %arg1, %c0_i32_24 : i32
    %40 = arith.extui %39 : i1 to i32
    %c0_i32_25 = arith.constant 0 : i32
    %41 = arith.cmpi ne, %40, %c0_i32_25 : i32
    scf.if %41 {
      %c0_26 = arith.constant 0 : index
      %c0_27 = arith.constant 0 : index
      %42 = vector.load %arg5[%c0_26, %c0_27] : memref<8x1xf32, #tpu.memory_space<vmem>>, vector<8x1xf32>
      %c0_28 = arith.constant 0 : index
      %c0_29 = arith.constant 0 : index
      %43 = vector.load %arg6[%c0_28, %c0_29] : memref<8x1xf32, #tpu.memory_space<vmem>>, vector<8x1xf32>
      %44 = math.log %43 : vector<8x1xf32>
      %45 = arith.addf %42, %44 : vector<8x1xf32>
      %c0_30 = arith.constant 0 : index
      %c0_31 = arith.constant 0 : index
      %46 = vector.load %arg7[%c0_30, %c0_31] : memref<8x1xf32, #tpu.memory_space<vmem>>, vector<8x1xf32>
      %cst_32 = arith.constant 3.200000e+01 : f32
      %47 = vector.broadcast %cst_32 : f32 to vector<8x1xf32>
      %48 = arith.mulf %47, %45 : vector<8x1xf32>
      %49 = arith.subf %46, %48 : vector<8x1xf32>
      %c0_33 = arith.constant 0 : index
      %c0_34 = arith.constant 0 : index
      %50 = vector.load %arg8[%c0_33, %c0_34] : memref<8x1xf32, #tpu.memory_space<vmem>>, vector<8x1xf32>
      %51 = arith.subf %50, %45 : vector<8x1xf32>
      %cst_35 = arith.constant 0.0032258064 : f32
      %52 = vector.broadcast %cst_35 : f32 to vector<8x1xf32>
      %53 = arith.mulf %52, %49 : vector<8x1xf32>
      %cst_36 = arith.constant 0.896774172 : f32
      %54 = vector.broadcast %cst_36 : f32 to vector<8x1xf32>
      %55 = arith.mulf %54, %51 : vector<8x1xf32>
      %56 = arith.addf %53, %55 : vector<8x1xf32>
      %cst_37 = arith.constant 0.000000e+00 : f32
      %57 = vector.broadcast %cst_37 : f32 to vector<8x1xf32>
      %58 = arith.subf %57, %56 : vector<8x1xf32>
      %c0_38 = arith.constant 0 : index
      %c0_39 = arith.constant 0 : index
      %59 = vector.load %arg4[%c0_38, %c0_39] : memref<8x1xf32, #tpu.memory_space<vmem>>, vector<8x1xf32>
      tpu.vector_store %arg4[%c0_38, %c0_39], %58 {strides = array<i32>} : memref<8x1xf32, #tpu.memory_space<vmem>>, vector<8x1xf32>,
    } else {
    }
    return
  }
  func.func @transform_0(%arg0: i32, %arg1: i32) -> (i32, i32) {
    %c0_i32 = arith.constant 0 : i32
    return %arg0, %arg1 : i32, i32
  }
  func.func @transform_1(%arg0: i32, %arg1: i32) -> (i32, i32) {
    %c0_i32 = arith.constant 0 : i32
    %c0_i32_0 = arith.constant 0 : i32
    return %arg0, %c0_i32 : i32, i32
  }
  func.func @transform_2(%arg0: i32, %arg1: i32) -> (i32, i32) {
    %c0_i32 = arith.constant 0 : i32
    %c0_i32_0 = arith.constant 0 : i32
    return %arg0, %c0_i32 : i32, i32
  }
}

</mosaic_0001>

<bundles_post_ra>
// kernel: tpu_custom_call.1
= control target key start
LH: loop header
LB: loop body
LE: loop exit
PB: predicated region body
PF: predicated region fallthrough
CT: control target
= control target key end

     0   :  { %vm22_vm0 = vcmask 261120   ;;  %vm15_vm1 = vcmask 7168   ;;  %v103_v1 = vmov -inf   ;;  %v104_v3 = vmov 0   ;;  %s143_s0 = inlined_call_operand.vmem [shape: f32[8,32], index: 0, kind: input, shape index: {}]   ;;  %s144_s1 = inlined_call_operand.vmem [shape: s32[8,1], index: 1, kind: input, shape index: {}]   ;;  %s145_s2 = inlined_call_operand.vmem [shape: f32[8,1], index: 2, kind: output, shape index: {}]  }
   0x1   :  { %v20_v0 = vld [vmem:[%s143_s0] sm:$0xff]  ;;  %16 = vst.msk [vmem:[#allocation2] sm:$0xff] %vm15_vm1, %v103_v1  ;;  %95 = vset.pattern.permute.xlu0 %v104_v3  ;;  %96 = vset.pattern.permute.xlu1 %v104_v3  ;;  %v105_v4 = vmov 0.0   ;;  %v53_v13 = vlaneseq }
   0x2   :  { %v23_v2 = vsel %vm22_vm0, %v20_v0, -inf  ;;  %17 = vst.msk [vmem:[#allocation3] sm:$0xff] %vm15_vm1, %v105_v4  ;;  %18 = vst.msk [vmem:[#allocation4] sm:$0xff] %vm15_vm1, %v105_v4  ;;  %v58_v5 = vld [vmem:[%s144_s1] sm:$0xff]  ;;  %v48_v18 = vsel %vm22_vm0, %v20_v0, 0.0 }
   0x3   :  { %24 = vmax.xlane.f32.xlu0 %v23_v2  ;;  %19 = vst.msk [vmem:[#allocation5] sm:$0xff] %vm15_vm1, %v105_v4  ;;  %61 = vperm.xlu1 %96, %v58_v5   ;;  %v54_v14 = vand.u32 127, %v53_v13 }
   0x8   :  { %v21_v6 = vld [vmem:[#allocation2] sm:$0xff] }
   0x9   :  { %v30_v23 = vld [vmem:[#allocation3] sm:$0xff]  ;;  %v47_v27 = vld [vmem:[#allocation4] sm:$0xff] }
   0xa   :  { %v59_v30 = vld [vmem:[#allocation5] sm:$0xff] }
  0x82   :  { %v62_v15 = vpop.permute.xlu1 %61 }
  0x83   :  { %vm63_vm2 = vcmp.eq.s32.totalorder %v54_v14, %v62_v15 }
  0x84   :  { %v64_v19 = vsel %vm63_vm2, %v20_v0, 0.0 }
  0x85   :  { %v65_v20 = vsel %vm22_vm0, %v64_v19, 0.0 }
  0x90   :  { %v25_v7 = vpop.xlane.xlu0 %24 }
  0x91   :  { %v26_v8 = vmax.f32 %v21_v6, %v25_v7 }
  0x93   :  { %v27_v9 = vsub.f32 %v21_v6, %v26_v8  ;;  %46 = vst.msk [vmem:[#allocation2] sm:$0xff] %vm15_vm1, %v26_v8  ;;  %34 = vperm.xlu0 %95, %v26_v8  }
  0x95   :  { %v28_v21 = vmul.f32 1.442695, %v27_v9 }
  0x9a   :  { %v73_v36 = vld [vmem:[#allocation2] sm:$0xff] }
 0x112   :  { %v35_v10 = vpop.permute.xlu0 %34 }
 0x113   :  { %v37_v11 = vsub.f32 %v20_v0, %v35_v10 }
 0x115   :  { %v38_v12 = vmul.f32 1.442695, %v37_v11 }
 0x117   :  { %97 = vpow2.f32 %v38_v12 }
 0x118   :  { %99 = vpow2.f32 %v28_v21 }
 0x121   :  { %v98_v16 = vpop.eup %97 }
 0x122   :  { %v40_v17 = vsel %vm22_vm0, %v98_v16, 0.0  ;;  %v100_v22 = vpop.eup %99 }
 0x123   :  { %41 = vadd.xlane.f32.xlu1 %v40_v17  ;;  %v31_v24 = vmul.f32 %v100_v22, %v30_v23 }
 0x127   :  { %49 = vadd.xlane.f32.xlu1 %v48_v18 }
 0x12b   :  { %66 = vadd.xlane.f32.xlu1 %v65_v20 }
 0x1b0   :  { %v42_v25 = vpop.xlane.xlu1 %41 }
 0x1b1   :  { %v43_v26 = vadd.f32 %v42_v25, %v31_v24 }
 0x1b3   :  { %45 = vst.msk [vmem:[#allocation3] sm:$0xff] %vm15_vm1, %v43_v26 }
 0x1b4   :  { %v50_v28 = vpop.xlane.xlu1 %49 }
 0x1b5   :  { %v51_v29 = vadd.f32 %v50_v28, %v47_v27 }
 0x1b7   :  { %52 = vst.msk [vmem:[#allocation4] sm:$0xff] %vm15_vm1, %v51_v29 }
 0x1b8   :  { %v67_v31 = vpop.xlane.xlu1 %66 }
 0x1b9   :  { %v68_v32 = vadd.f32 %v67_v31, %v59_v30 }
 0x1ba   :  { %v74_v33 = vld [vmem:[#allocation3] sm:$0xff] }
 0x1bb   :  { %101 = vlog2.f32 %v74_v33  ;;  %69 = vst.msk [vmem:[#allocation5] sm:$0xff] %vm15_vm1, %v68_v32 }
 0x1be   :  { %v78_v41 = vld [vmem:[#allocation4] sm:$0xff] }
 0x1c2   :  { %v81_v37 = vld [vmem:[#allocation5] sm:$0xff] }
 0x1c5   :  { %v102_v34 = vpop.eup %101 }
 0x1c6   :  { %v76_v35 = vmul.f32 0.6931472, %v102_v34 }
 0x1c8   :  { %v77_v38 = vadd.f32 %v76_v35, %v73_v36 }
 0x1ca   :  { %v79_v39 = vmul.f32 32.0, %v77_v38  ;;  %v82_v40 = vsub.f32 %v81_v37, %v77_v38 }
 0x1cc   :  { %v80_v42 = vsub.f32 %v78_v41, %v79_v39  ;;  %v84_v44 = vmul.f32 0.8967742, %v82_v40 }
 0x1ce   :  { %v83_v43 = vmul.f32 0.0032258064, %v80_v42 }
 0x1d0   :  { %v85_v45 = vadd.f32 %v84_v44, %v83_v43 }
 0x1d2   :  { %v86_v46 = vsub.f32 0.0, %v85_v45 }
 0x1d4   :  { %87 = vst.msk [vmem:[%s145_s2] sm:$0xff] %vm15_vm1, %v86_v46 }

</bundles_post_ra>
